<compile_context>
chip_gen: v7x
topology: tpu7x:2x2x1
jax: 0.10.0
libtpu: 0.0.40
codegen_flags: <defaults>
</compile_context>

<pallas_src>
import functools

import jax
import jax.numpy as jnp
from jax.experimental import pallas as pl
from jax.experimental.pallas import tpu as pltpu

_EPS = 1e-05
_LANES = 128
_SUBLANES = 8


def _round_up(x, m):
    return ((x + m - 1) // m) * m


def _ce_stable_kernel(logits_ref, labels_ref, partial_ref, *, n_rows, tile_n, eps):
    # logits_ref: (tile_n, C) native dtype, labels_ref: (tile_n, 1) i32,
    # partial_ref: (1, 8, 128) f32 lane-padded per-tile partial sum.
    i = pl.program_id(0)

    x = logits_ref[...].astype(jnp.float32)                     # cast AFTER DMA (bf16-friendly)
    tn, c = x.shape

    # numerically-stable softmax pieces only (no full prob / log-prob arrays)
    m = jnp.max(x, axis=-1, keepdims=True)                      # (tile_n, 1)
    e = jnp.exp(x - m)                                          # (tile_n, C)
    s = jnp.sum(e, axis=-1, keepdims=True)                      # (tile_n, 1)

    # pick exp at the label column via one-hot (no dynamic vector gather on TPU)
    col = jax.lax.broadcasted_iota(jnp.int32, (tn, c), 1)       # (tile_n, C)
    onehot = (col == labels_ref[...]).astype(jnp.float32)       # labels (tile_n,1) broadcast
    e_lbl = jnp.sum(onehot * e, axis=-1, keepdims=True)         # (tile_n, 1)

    # -log(softmax[label] + eps) == log(s) - log(e_lbl + eps*s)   (exactly the same algebra)
    row_loss = jnp.log(s) - jnp.log(e_lbl + jnp.float32(eps) * s)   # (tile_n, 1)

    # mask rows that belong to the zero-padding of the (possibly partial) last tile
    row = jax.lax.broadcasted_iota(jnp.int32, (tn, 1), 0) + i * tile_n
    valid = (row < n_rows).astype(jnp.float32)                  # (tile_n, 1)
    partial = jnp.sum(row_loss * valid)                         # scalar partial sum (not yet / N)

    partial_ref[...] = jnp.full((1, _SUBLANES, _LANES), partial, jnp.float32)


def cross_entropy_loss_stable(logits, labels, eps=_EPS):
    """logits: (N, C) float (f32 or bf16), labels: (N,) int -> scalar f32 loss (mean)."""
    n, c = logits.shape
    itemsize = jnp.dtype(logits.dtype).itemsize

    # batch tile: multiple of 8 sublanes, capped by a ~4 MiB per-tile VMEM budget so the
    # double-buffered pipeline fits comfortably on v7x (64 MiB physical / 32 MiB scoped).
    budget_rows = max(_SUBLANES, (4 * 1024 * 1024) // max(1, c * itemsize))
    tile_n = min(512, budget_rows, _round_up(n, _SUBLANES))
    tile_n = max(_SUBLANES, (tile_n // _SUBLANES) * _SUBLANES)
    n_pad = _round_up(n, tile_n)
    num_tiles = n_pad // tile_n

    # pad batch (zeros for logits, 0 for labels); padded rows are masked inside the kernel
    logits_p = logits if n_pad == n else jnp.pad(logits, ((0, n_pad - n), (0, 0)))
    labels2d = labels.astype(jnp.int32).reshape(n, 1)
    labels_p = labels2d if n_pad == n else jnp.pad(labels2d, ((0, n_pad - n), (0, 0)))

    kernel = functools.partial(_ce_stable_kernel, n_rows=n, tile_n=tile_n, eps=eps)

    # TODO(synk): for very large C (big vocab) add a second grid axis over the class dim
    # with an online (m, s, e_lbl) carry instead of keeping all of C resident per tile.
    partials = pl.pallas_call(
        kernel,
        out_shape=jax.ShapeDtypeStruct((num_tiles, _SUBLANES, _LANES), jnp.float32),
        grid=(num_tiles,),
        in_specs=[
            pl.BlockSpec((tile_n, c), lambda i: (i, 0)),   # native dtype, cast in-kernel
            pl.BlockSpec((tile_n, 1), lambda i: (i, 0)),
        ],
        out_specs=pl.BlockSpec((1, _SUBLANES, _LANES), lambda i: (i, 0, 0)),
        compiler_params=pltpu.CompilerParams(
            dimension_semantics=("parallel",),             # independent tiles -> both TCs on v7x
            vmem_limit_bytes=32 * 1024 * 1024,
        ),
    )(logits_p, labels_p)

    # tiny final reduce over per-tile partial sums + single multiply by 1/N (mean reduction)
    return jnp.sum(partials[:, 0, 0]) * jnp.float32(1.0 / n)


def _reference(logits, labels, eps=_EPS):
    p = jax.nn.softmax(logits.astype(jnp.float32), axis=-1)
    logp = jnp.log(p + eps)
    return -jnp.mean(logp[jnp.arange(logits.shape[0]), labels])


if __name__ == "__main__":
    key = jax.random.PRNGKey(0)
    k1, k2, k3, k4 = jax.random.split(key, 4)

    # CIFAR-10-like small shape: 8 samples, 10 classes
    N, C = 8, 10
    logits = jax.random.normal(k1, (N, C), dtype=jnp.float32)
    labels = jax.random.randint(k2, (N,), 0, C, dtype=jnp.int32)

    loss = cross_entropy_loss_stable(logits, labels)
    loss = jax.block_until_ready(loss)
    ref = _reference(logits, labels)
    assert jnp.allclose(loss, ref, atol=1e-5, rtol=1e-5), (loss, ref)

    # extra check: batch not a multiple of the sublane tile (exercises row masking)
    N2 = 13
    logits2 = jax.random.normal(k3, (N2, C), dtype=jnp.float32)
    labels2 = jax.random.randint(k4, (N2,), 0, C, dtype=jnp.int32)
    loss2 = jax.block_until_ready(cross_entropy_loss_stable(logits2, labels2))
    ref2 = _reference(logits2, labels2)
    assert jnp.allclose(loss2, ref2, atol=1e-5, rtol=1e-5), (loss2, ref2)

    print("KERNEL_OK")
</pallas_src>

<mosaic_0001>
module attributes {stable_mosaic.version = 11 : i64} {
  func.func @_ce_stable_kernel(%arg0: i32, %arg1: memref<8x10xf32, #tpu.memory_space<vmem>>, %arg2: memref<8x1xi32, #tpu.memory_space<vmem>>, %arg3: memref<1x8x128xf32, #tpu.memory_space<vmem>>) attributes {dimension_semantics = [#tpu.dimension_semantics<parallel>], iteration_bounds = array<i64: 1>, scalar_prefetch = 0 : i64, scratch_operands = 0 : i64, tpu.core_type = #tpu.core_type<tc>, window_params = [{transform_indices = @transform_0, window_bounds = array<i64: 8, 10>}, {transform_indices = @transform_1, window_bounds = array<i64: 8, 1>}, {transform_indices = @transform_2, window_bounds = array<i64: 1, 8, 128>}]} {
    %c0 = arith.constant 0 : index
    %c0_0 = arith.constant 0 : index
    %0 = vector.load %arg1[%c0, %c0_0] : memref<8x10xf32, #tpu.memory_space<vmem>>, vector<8x10xf32>
    %cst = arith.constant dense<0xFF800000> : vector<8xf32>
    %1 = vector.multi_reduction <maximumf>, %0, %cst [1] : vector<8x10xf32> to vector<8xf32>
    %2 = vector.shape_cast %1 : vector<8xf32> to vector<8x1xf32>
    %3 = vector.broadcast %2 : vector<8x1xf32> to vector<8x10xf32>
    %4 = arith.subf %0, %3 : vector<8x10xf32>
    %5 = math.exp %4 : vector<8x10xf32>
    %cst_1 = arith.constant dense<0.000000e+00> : vector<8xf32>
    %6 = vector.multi_reduction <add>, %5, %cst_1 [1] : vector<8x10xf32> to vector<8xf32>
    %7 = vector.shape_cast %6 : vector<8xf32> to vector<8x1xf32>
    %8 = tpu.iota {dimensions = array<i32: 1>} : vector<8x10xi32>
    %c0_2 = arith.constant 0 : index
    %c0_3 = arith.constant 0 : index
    %9 = vector.load %arg2[%c0_2, %c0_3] : memref<8x1xi32, #tpu.memory_space<vmem>>, vector<8x1xi32>
    %10 = vector.broadcast %9 : vector<8x1xi32> to vector<8x10xi32>
    %11 = arith.cmpi eq, %8, %10 : vector<8x10xi32>
    %12 = arith.extui %11 : vector<8x10xi1> to vector<8x10xi32>
    %13 = arith.sitofp %12 : vector<8x10xi32> to vector<8x10xf32>
    %14 = arith.mulf %13, %5 : vector<8x10xf32>
    %cst_4 = arith.constant dense<0.000000e+00> : vector<8xf32>
    %15 = vector.multi_reduction <add>, %14, %cst_4 [1] : vector<8x10xf32> to vector<8xf32>
    %16 = vector.shape_cast %15 : vector<8xf32> to vector<8x1xf32>
    %17 = math.log %7 : vector<8x1xf32>
    %cst_5 = arith.constant 9.99999974E-6 : f32
    %18 = vector.broadcast %cst_5 : f32 to vector<8x1xf32>
    %19 = arith.mulf %18, %7 : vector<8x1xf32>
    %20 = arith.addf %16, %19 : vector<8x1xf32>
    %21 = math.log %20 : vector<8x1xf32>
    %22 = arith.subf %17, %21 : vector<8x1xf32>
    %23 = tpu.iota {dimensions = array<i32: 0>} : vector<8x1xi32>
    %c8_i32 = arith.constant 8 : i32
    %24 = arith.muli %arg0, %c8_i32 : i32
    %25 = vector.broadcast %24 : i32 to vector<8x1xi32>
    %26 = arith.addi %23, %25 : vector<8x1xi32>
    %c8_i32_6 = arith.constant 8 : i32
    %27 = vector.broadcast %c8_i32_6 : i32 to vector<8x1xi32>
    %28 = arith.cmpi slt, %26, %27 : vector<8x1xi32>
    %29 = arith.extui %28 : vector<8x1xi1> to vector<8x1xi32>
    %30 = arith.sitofp %29 : vector<8x1xi32> to vector<8x1xf32>
    %31 = arith.mulf %22, %30 : vector<8x1xf32>
    %32 = vector.shape_cast %31 : vector<8x1xf32> to vector<1x8x1xf32>
    %cst_7 = arith.constant dense<0.000000e+00> : vector<1xf32>
    %33 = vector.multi_reduction <add>, %32, %cst_7 [1, 2] : vector<1x8x1xf32> to vector<1xf32>
    %34 = vector.shape_cast %33 : vector<1xf32> to vector<1x1x1xf32>
    %35 = vector.extract %34[0, 0, 0] : f32 from vector<1x1x1xf32>
    %36 = vector.broadcast %35 : f32 to vector<1x8x128xf32>
    %c0_8 = arith.constant 0 : index
    %c0_9 = arith.constant 0 : index
    %c0_10 = arith.constant 0 : index
    %37 = vector.load %arg3[%c0_8, %c0_9, %c0_10] : memref<1x8x128xf32, #tpu.memory_space<vmem>>, vector<1x8x128xf32>
    tpu.vector_store %arg3[%c0_8, %c0_9, %c0_10], %36 {strides = array<i32>} : memref<1x8x128xf32, #tpu.memory_space<vmem>>, vector<1x8x128xf32>,
    return
  }
  func.func @transform_0(%arg0: i32) -> (i32, i32) {
    %c0_i32 = arith.constant 0 : i32
    %c0_i32_0 = arith.constant 0 : i32
    return %arg0, %c0_i32 : i32, i32
  }
  func.func @transform_1(%arg0: i32) -> (i32, i32) {
    %c0_i32 = arith.constant 0 : i32
    %c0_i32_0 = arith.constant 0 : i32
    return %arg0, %c0_i32 : i32, i32
  }
  func.func @transform_2(%arg0: i32) -> (i32, i32, i32) {
    %c0_i32 = arith.constant 0 : i32
    %c0_i32_0 = arith.constant 0 : i32
    %c0_i32_1 = arith.constant 0 : i32
    return %arg0, %c0_i32, %c0_i32_0 : i32, i32, i32
  }
}

</mosaic_0001>

<bundles_post_ra>
// kernel: tpu_custom_call.1
= control target key start
LH: loop header
LB: loop body
LE: loop exit
PB: predicated region body
PF: predicated region fallthrough
CT: control target
= control target key end

     0   :  { %vm13_vm0 = vcmask 80896   ;;  %s155_s0 = inlined_call_operand.vmem [shape: f32[8,10], index: 0, kind: input, shape index: {}]   ;;  %s156_s1 = inlined_call_operand.vmem [shape: s32[8,1], index: 1, kind: input, shape index: {}]   ;;  %s157_s2 = inlined_call_operand.hbm [shape: f32[1,8,128], index: 2, kind: output, shape index: {}]  }
   0x1   :  { %v12_v0 = vld [vmem:[%s155_s0] sm:$0xff] }
   0x2   :  { %7 = vsyncpa [#allocation3], 0  ;;  %v14_v1 = vsel %vm13_vm0, %v12_v0, -inf  ;;  %v116_v2 = vmov 0   ;;  %v25_v3 = vld [vmem:[%s156_s1] sm:$0xff]  ;;  %v23_v6 = vlaneseq  ;;  %v117_v10 = vmov 0.0  }
   0x3   :  { %85 = vset.pattern.permute.xlu0 %v116_v2  ;;  %vm52_vm2 = vcmask 7168   ;;  %s118_s0 = smov [#allocation2]  }
   0x4   :  { %15 = vmax.xlane.f32.xlu0 %v14_v1  ;;  %v24_v8 = vand.u32 127, %v23_v6  ;;  %s71_s1 = sshll.u32 %s118_s0, 4  ;;  %s72_s1 = int_to_ptr.vmem [resolvable:$true] %s71_s1 }
   0x5   :  { %s92_s14 = scalar_lea.vmem %s72_s1, 128  ;;  %p97_p1 = scmp.lt.s32.totalorder %s72_s1, %s72_s1 }
   0x6   :  { %p93_p0 = scmp.ne.s32.totalorder %s72_s1, %s92_s14  ;;  %p98_p2 = scmp.lt.s32.totalorder %s92_s14, %s92_s14 }
   0x8   :  { %p99_p3 = por %p98_p2, %p97_p1 }
   0xa   :  { %p100_p4 = pnand %p99_p3, %p93_p0 }
  0x1a   :  { %27 = vperm.xlu0 %85, %v25_v3  }
  0x91   :  { %v16_v4 = vpop.xlane.xlu0 %15 }
  0x92   :  { %v17_v5 = vsub.f32 %v12_v0, %v16_v4 }
  0x94   :  { %v18_v7 = vmul.f32 1.442695, %v17_v5 }
  0x96   :  { %86 = vpow2.f32 %v18_v7 }
  0x99   :  { %v28_v9 = vpop.permute.xlu0 %27 }
  0x9a   :  { %vm29_vm1 = vcmp.eq.s32.totalorder %v24_v8, %v28_v9 }
  0x9b   :  { %v79_v11 = vsel %vm29_vm1, 1.0, %v117_v10 }
  0xa0   :  { %v87_v12 = vpop.eup %86 }
  0xa1   :  { %v20_v13 = vsel %vm13_vm0, %v87_v12, 0.0  ;;  %v32_v14 = vmul.f32 %v87_v12, %v79_v11 }
  0xa2   :  { %21 = vadd.xlane.f32.xlu1 %v20_v13 }
  0xa3   :  { %v33_v15 = vsel %vm13_vm0, %v32_v14, 0.0 }
  0xa6   :  { %34 = vadd.xlane.f32.xlu1 %v33_v15 }
 0x12f   :  { %v22_v16 = vpop.xlane.xlu1 %21 }
 0x130   :  { %v38_v17 = vmul.f32 1e-05, %v22_v16  ;;  %88 = vlog2.f32 %v22_v16 }
 0x133   :  { %v35_v18 = vpop.xlane.xlu1 %34 }
 0x134   :  { %v39_v19 = vadd.f32 %v38_v17, %v35_v18 }
 0x136   :  { %90 = vlog2.f32 %v39_v19 }
 0x13a   :  { %v89_v20 = vpop.eup %88 }
 0x13b   :  { %v37_v23 = vmul.f32 0.6931472, %v89_v20 }
 0x140   :  { %v91_v21 = vpop.eup %90 }
 0x141   :  { %v41_v22 = vmul.f32 0.6931472, %v91_v21 }
 0x143   :  { %v42_v24 = vsub.f32 %v37_v23, %v41_v22 }
 0x145   :  { %v53_v25 = vsel %vm52_vm2, %v42_v24, 0.0 }
 0x146   :  { %54 = vadd.xlane.f32.xlu1 %v53_v25 }
 0x1d3   :  { %v55_v26 = vpop.xlane.xlu1 %54 }
 0x1d4   :  { %v56_v27 = vrot.slane %v55_v26, 4 }
 0x1d6   :  { %v57_v28 = vadd.f32 %v56_v27, %v55_v26 }
 0x1d8   :  { %v58_v29 = vrot.slane %v57_v28, 2 }
 0x1da   :  { %v59_v30 = vadd.f32 %v58_v29, %v57_v28 }
 0x1dc   :  { %v60_v31 = vrot.slane %v59_v30, 1 }
 0x1de   :  { %v61_v32 = vadd.f32 %v60_v31, %v59_v30 }
 0x1e0   :  { %80 = vpush %v61_v32 }
 0x211   :  { %s81_s13 = spop %80 }
 0x212   :  { %v63_v33 = vstv %s81_s13 }
 0x213   :  { %64 = vst [vmem:[#allocation2] sm:$0xff] %v63_v33 }
 0x214   :  { %103 = shalt.err (!%p100_p4)
}
 0x215   :  { %s104_s17 = scalar_lea.hbm %s157_s2, 128 }
 0x216   :  { %p105_p5 = scmp.ne.s32.totalorder %s157_s2, %s104_s17  ;;  %p108_p6 = scmp.lt.u32.totalorder %s104_s17, %s157_s2 }
 0x218   :  { %p110_p7 = pnand %p108_p6, %p105_p5 }
 0x21a   :  { %113 = shalt.err (!%p110_p7)
}
 0x21b   :  { %74 = dma.vmem_to_hbm [thread:$0]  %s72_s1, 128, %s157_s2, [#allocation3]  }
 0x21c   :  { %114 = dma.done.wait [#allocation3], 128  }
 0x21d   :  { %115 = vsyncadd [#allocation3], 4294967168 }
 0x21e   :  { %78 = vsyncpa [#allocation3], 1 }

</bundles_post_ra>
